<compile_context>
chip_gen: v6e
topology: v6e:2x2x1
jax: 0.10.0
libtpu: 0.0.40
codegen_flags: <defaults>
</compile_context>

<pallas_src>
import functools

import jax
import jax.numpy as jnp
from jax.experimental import pallas as pl
from jax.experimental.pallas import tpu as pltpu

EPS = 1e-5
_HIGHEST = jax.lax.Precision.HIGHEST
_DEFAULT = jax.lax.Precision.DEFAULT


# --------------------------------------------------------------------------- #
# VMEM / tiling helpers
# --------------------------------------------------------------------------- #
def _round_up(v, m):
    return (v + m - 1) // m * m


@functools.lru_cache(maxsize=1)
def _default_vmem_limit():
    """Generation-aware VMEM limit (bytes) with a conservative fallback."""
    cap = None
    try:
        cap = getattr(pltpu.get_tpu_info(), "vmem_capacity_bytes", None)
    except Exception:
        cap = None
    if not cap:
        cap = 64 * 1024 * 1024                      # conservative: v7x
    return int(min(cap * 3 // 4, 100 * 1024 * 1024))


def _default_block_budget(c, itemsize, vmem_limit_bytes):
    """Bytes for ONE x block, accounting for double-buffered in/out blocks,
    f32 temporaries and the resident (C, C) constants."""
    c_sub = _round_up(c, 16 if itemsize < 4 else 8)
    c_lane = _round_up(c, 128)
    const_bytes = 2 * c_sub * c_lane * 4            # Bo + gram (lane-padded f32)
    avail = max(vmem_limit_bytes - 2 * const_bytes - (2 << 20), 1 << 20)
    factor = 4 + 2 * max(4 // itemsize, 1)          # 2x in + 2x out + f32 temps
    return int(min(max(avail // factor, 256 * 1024), 8 << 20))


def _pick_spatial_tile(hw, c_sub, itemsize, budget_bytes):
    """Largest 128-multiple tile dividing hw that fits the budget; full hw when
    hw is not 128-divisible (lane constraint on block shapes)."""
    if hw % 128 != 0:
        return hw
    max_t = (budget_bytes // max(c_sub * itemsize, 1)) // 128 * 128
    if max_t >= hw:
        return hw
    max_t = max(max_t, 128)
    for cand in range(max_t, 127, -128):
        if hw % cand == 0:
            return cand
    return 128


def _fused_fits(n, c, hw, itemsize, vmem_limit_bytes):
    """Conservative VMEM estimate for the single fused kernel."""
    c_sub_x = _round_up(c, 16 if itemsize < 4 else 8)
    c_sub_f = _round_up(c, 8)
    hw_lane = _round_up(hw, 128)
    x_bytes = n * c_sub_x * hw_lane * itemsize
    f32_bytes = n * c_sub_f * hw_lane * 4
    c_mat = c_sub_f * _round_up(c, 128) * 4
    est = 4 * x_bytes + 3 * f32_bytes + 4 * c_mat + (1 << 20)
    return est <= int(0.7 * vmem_limit_bytes)


def _pass2_const_spec(shape, single_buffer):
    """BlockSpec for a grid-invariant constant of the apply pass."""
    idx = lambda n, t: (0, 0)
    if single_buffer:
        # Constants never change block index; one VMEM buffer is enough (saves
        # C*C*esize of VMEM at large C, which matters on v7x's 64 MiB VMEM).
        try:
            return pl.BlockSpec(shape, idx, pipeline_mode=pl.Buffered(1))
        except Exception:
            pass  # pipeline_mode unsupported in this JAX build -> default
    return pl.BlockSpec(shape, idx)


# --------------------------------------------------------------------------- #
# Kernels
# --------------------------------------------------------------------------- #
def _stats_kernel(x_ref, sum_ref, gram_ref, *, precision):
    """Pass 1: per-group partial sum(x) and Gram = sum_p x_p x_p^T."""
    @pl.when((pl.program_id(1) == 0) & (pl.program_id(2) == 0))
    def _():
        sum_ref[...] = jnp.zeros_like(sum_ref)
        gram_ref[...] = jnp.zeros_like(gram_ref)

    x = x_ref[...]                                            # (C, T), native dtype
    sum_ref[...] += jnp.sum(x.astype(jnp.float32), axis=1, keepdims=True)
    # Gram on the MXU (vex slot): free under the HBM-read roofline even when C
    # is tiny and the systolic array is mostly zeros.
    gram_ref[...] += jax.lax.dot_general(
        x, x, (((1,), (1,)), ((), ())),
        preferred_element_type=jnp.float32, precision=precision)


def _apply_kernel(x_ref, bo_ref, scale_ref, e_ref, o_ref, *, precision):
    """Pass 2: out = scale*x + Bo@x + e  (BN1 -> conv1x1 -> +x -> BN2, fused).

    The residual/identity term is an exact f32 VPU multiply; the MXU only
    carries the small-magnitude conv contribution.
    """
    x = x_ref[...]                                            # (C, T), native dtype
    y = jnp.dot(bo_ref[...], x, preferred_element_type=jnp.float32,
                precision=precision)                          # (C, T) f32
    out = scale_ref[...] * x.astype(jnp.float32) + y + e_ref[...]
    o_ref[...] = out.astype(o_ref.dtype)


def _fused_kernel(x_ref, w_ref, g1_ref, b1_ref, g2_ref, b2_ref, o_ref, *,
                  precision):
    """Whole activation resident in VMEM: BN1 -> conv -> +x -> BN2 in one pass
    (one HBM read of x, one HBM write of the output)."""
    xf = x_ref[...].astype(jnp.float32)                       # (N, C, HW)
    n, c, hw = xf.shape
    inv_m = 1.0 / (n * hw)

    def ch_stats(v):                                          # -> (C,1), (C,1)
        s1 = jnp.sum(jnp.sum(v, axis=2, keepdims=True), axis=0)
        s2 = jnp.sum(jnp.sum(v * v, axis=2, keepdims=True), axis=0)
        return s1 * inv_m, s2 * inv_m

    mu1, ex2 = ch_stats(xf)
    a1 = g1_ref[...] * jax.lax.rsqrt(ex2 - mu1 * mu1 + EPS)   # (C, 1)
    c1 = b1_ref[...] - a1 * mu1
    xb = a1[None] * xf + c1[None]                             # BN1(x)

    wb = jnp.broadcast_to(w_ref[...].astype(jnp.float32), (n, c, c))
    y = jax.lax.dot_general(                                  # conv1x1 per image
        wb, xb, (((2,), (1,)), ((0,), (0,))),
        preferred_element_type=jnp.float32, precision=precision)
    s = xf + y                                                # residual

    mu2, es2 = ch_stats(s)
    alpha = g2_ref[...] * jax.lax.rsqrt(es2 - mu2 * mu2 + EPS)
    beta = b2_ref[...] - alpha * mu2
    o_ref[...] = (alpha[None] * s + beta[None]).astype(o_ref.dtype)


# --------------------------------------------------------------------------- #
# Wrapper
# --------------------------------------------------------------------------- #
@functools.partial(
    jax.jit,
    static_argnames=("block_budget_bytes", "vmem_limit_bytes", "use_fused"))
def _adapter_forward(x, w, g1, b1, g2, b2, *, block_budget_bytes,
                     vmem_limit_bytes, use_fused):
    N, C, H, W = x.shape
    HW = H * W
    M = N * HW
    itemsize = jnp.dtype(x.dtype).itemsize
    f32_in = x.dtype == jnp.float32
    xr = x.reshape(N, C, HW)                  # free: NCHW is contiguous

    # ---------------- fused single-kernel path ------------------------------
    if use_fused:
        fused_prec = _HIGHEST if f32_in else _DEFAULT
        col = lambda v: v.astype(jnp.float32).reshape(C, 1)
        out = pl.pallas_call(
            functools.partial(_fused_kernel, precision=fused_prec),
            out_shape=jax.ShapeDtypeStruct((N, C, HW), x.dtype),
            grid=(1,),
            in_specs=[pl.BlockSpec((N, C, HW), lambda i: (0, 0, 0)),
                      pl.BlockSpec((C, C), lambda i: (0, 0)),
                      pl.BlockSpec((C, 1), lambda i: (0, 0)),
                      pl.BlockSpec((C, 1), lambda i: (0, 0)),
                      pl.BlockSpec((C, 1), lambda i: (0, 0)),
                      pl.BlockSpec((C, 1), lambda i: (0, 0))],
            out_specs=pl.BlockSpec((N, C, HW), lambda i: (0, 0, 0)),
            compiler_params=pltpu.CompilerParams(
                dimension_semantics=("arbitrary",),
                vmem_limit_bytes=vmem_limit_bytes),
        )(xr, w.astype(jnp.float32), col(g1), col(b1), col(g2), col(b2))
        return out.reshape(N, C, H, W)

    # ---------------- streaming two-pass path -------------------------------
    c_sub = _round_up(C, 16 if itemsize < 4 else 8)
    T = _pick_spatial_tile(HW, c_sub, itemsize, block_budget_bytes)
    n_t = HW // T

    # Megacore grouping for pass 1: leading "parallel" axis of (up to) 2 groups
    # (split over batch when possible, otherwise over spatial tiles).
    if N % 2 == 0:
        G, n_in, t_in, gn, gt = 2, N // 2, n_t, N // 2, 0
    elif n_t % 2 == 0:
        G, n_in, t_in, gn, gt = 2, N, n_t // 2, 0, n_t // 2
    else:
        G, n_in, t_in, gn, gt = 1, N, n_t, 0, 0
        # TODO(synk): odd N and odd n_t leaves pass 1 on one core on v7x.

    # Stats matmul: HIGHEST for f32 inputs (BN-variance accuracy).  Apply
    # matmul: HIGHEST only while comfortably under the f32 MXU roofline.
    stats_prec = _HIGHEST if f32_in else _DEFAULT
    apply_prec = _HIGHEST if (f32_in and C <= 128) else _DEFAULT

    # ---- pass 1: per-group partial sums + Gram (one HBM read of x) ---------
    x_stats_spec = pl.BlockSpec(
        (None, C, T), lambda g, n, t: (g * gn + n, 0, g * gt + t))
    part_sum, part_gram = pl.pallas_call(
        functools.partial(_stats_kernel, precision=stats_prec),
        out_shape=(jax.ShapeDtypeStruct((G, C, 1), jnp.float32),
                   jax.ShapeDtypeStruct((G, C, C), jnp.float32)),
        grid=(G, n_in, t_in),
        in_specs=[x_stats_spec],
        out_specs=(pl.BlockSpec((None, C, 1), lambda g, n, t: (g, 0, 0)),
                   pl.BlockSpec((None, C, C), lambda g, n, t: (g, 0, 0))),
        compiler_params=pltpu.CompilerParams(
            dimension_semantics=("parallel", "arbitrary", "arbitrary"),
            vmem_limit_bytes=vmem_limit_bytes),
    )(xr)

    # ---- closed-form BN1/BN2 statistics -> fused affine map (O(C^2-C^3)) ---
    wf = w.astype(jnp.float32)
    g1f, b1f = g1.astype(jnp.float32), b1.astype(jnp.float32)
    g2f, b2f = g2.astype(jnp.float32), b2.astype(jnp.float32)
    sum_c = jnp.sum(part_sum, axis=0)[:, 0]                   # (C,)
    gram = jnp.sum(part_gram, axis=0)                         # (C, C)

    with jax.default_matmul_precision("float32"):             # tiny, keep exact
        mu1 = sum_c / M
        cov = gram / M - jnp.outer(mu1, mu1)                  # Cov(x)
        a1 = g1f * jax.lax.rsqrt(jnp.diagonal(cov) + EPS)     # gamma1 / sigma1
        Wd = wf * a1[None, :]                                 # conv o BN1 (linear)
        d = wf @ (b1f - a1 * mu1)
        A = jnp.eye(C, dtype=jnp.float32) + Wd                # s = A x + d
        mu2 = A @ mu1 + d
        var2 = jnp.sum((A @ cov) * A, axis=1)                 # diag(A Cov A^T)
        alpha = g2f * jax.lax.rsqrt(var2 + EPS)               # gamma2 / sigma2
        Bo = alpha[:, None] * Wd                              # out = a*x + Bo x + e
        evec = alpha * (d - mu2) + b2f

    bo = Bo.astype(x.dtype)                                   # bf16 copy for bf16 x
    scale = alpha.reshape(C, 1)
    evec = evec.reshape(C, 1)

    # ---- pass 2: apply fused map (second HBM read of x, one write) ---------
    single_buf = C * C * jnp.dtype(bo.dtype).itemsize >= (2 << 20)
    x_spec = pl.BlockSpec((None, C, T), lambda n, t: (n, 0, t))
    out = pl.pallas_call(
        functools.partial(_apply_kernel, precision=apply_prec),
        out_shape=jax.ShapeDtypeStruct((N, C, HW), x.dtype),
        grid=(N, n_t),
        in_specs=[x_spec,
                  _pass2_const_spec((C, C), single_buf),
                  _pass2_const_spec((C, 1), False),
                  _pass2_const_spec((C, 1), False)],
        out_specs=x_spec,
        compiler_params=pltpu.CompilerParams(
            dimension_semantics=("parallel", "parallel"),
            vmem_limit_bytes=vmem_limit_bytes),
    )(xr, bo, scale, evec)
    return out.reshape(N, C, H, W)


def adapter_forward(x, w, g1, b1, g2, b2, *, block_budget_bytes=None,
                    vmem_limit_bytes=None, allow_fused=True):
    """Adapter forward.  x: (N, C, H, W); w: (C, C) 1x1-conv weight; g*/b*: (C,)."""
    N, C, H, W = x.shape
    itemsize = jnp.dtype(x.dtype).itemsize
    if vmem_limit_bytes is None:
        vmem_limit_bytes = _default_vmem_limit()
    if block_budget_bytes is None:
        block_budget_bytes = _default_block_budget(C, itemsize, vmem_limit_bytes)
    use_fused = bool(allow_fused) and _fused_fits(
        N, C, H * W, itemsize, vmem_limit_bytes)
    return _adapter_forward(x, w, g1, b1, g2, b2,
                            block_budget_bytes=int(block_budget_bytes),
                            vmem_limit_bytes=int(vmem_limit_bytes),
                            use_fused=use_fused)


# --------------------------------------------------------------------------- #
# Reference + test
# --------------------------------------------------------------------------- #
def adapter_ref(x, w, g1, b1, g2, b2):
    """Pure-JAX reference mirroring the PyTorch module (training-mode BN)."""
    def bn(t, g, b):
        mean = jnp.mean(t, axis=(0, 2, 3), keepdims=True)
        var = jnp.mean((t - mean) ** 2, axis=(0, 2, 3), keepdims=True)
        tn = (t - mean) * jax.lax.rsqrt(var + EPS)
        return tn * g.reshape(1, -1, 1, 1) + b.reshape(1, -1, 1, 1)

    xb = bn(x, g1, b1)
    y = jnp.einsum("nchw,oc->nohw", xb, w,
                   precision=jax.lax.Precision.HIGHEST)       # 1x1 conv, no bias
    return bn(x + y, g2, b2)


if __name__ == "__main__":
    key = jax.random.PRNGKey(0)
    kx, kw, k1, k2, k3, k4 = jax.random.split(key, 6)

    N, C, H, W = 2, 4, 16, 16                                 # planes = 4
    x = jax.random.normal(kx, (N, C, H, W), dtype=jnp.float32)
    w = 0.1 * jax.random.normal(kw, (C, C), dtype=jnp.float32)       # Conv2d(C,C,1)
    g1 = 1.0 + 0.1 * jax.random.normal(k1, (C,), dtype=jnp.float32)  # BN1 weight
    b1 = 0.1 * jax.random.normal(k2, (C,), dtype=jnp.float32)        # BN1 bias
    g2 = 1.0 + 0.1 * jax.random.normal(k3, (C,), dtype=jnp.float32)  # BN2 weight
    b2 = 0.1 * jax.random.normal(k4, (C,), dtype=jnp.float32)        # BN2 bias

    def check(xin, **kwargs):
        got = jax.block_until_ready(
            adapter_forward(xin, w, g1, b1, g2, b2, **kwargs))
        want = adapter_ref(xin, w, g1, b1, g2, b2)
        assert got.shape == xin.shape
        err = float(jnp.max(jnp.abs(got - want)))
        assert jnp.allclose(got, want, rtol=1e-4, atol=1e-4), err

    # 1) fused single-kernel path (whole activation resident in VMEM).
    check(x)

    # 2) streaming path: spatial axis split into 128-lane tiles, pass-1
    #    partial accumulators split over the batch (megacore grouping).
    x2 = jax.random.normal(kx, (2, C, 32, 32), dtype=jnp.float32)
    check(x2, allow_fused=False, block_budget_bytes=4096)

    # 3) streaming path with a non-128-divisible spatial extent (7x7).
    x3 = jax.random.normal(kx, (2, C, 7, 7), dtype=jnp.float32)
    check(x3, allow_fused=False)

    # 4) streaming path, N == 1 -> pass-1 grouping splits the spatial tiles.
    x4 = jax.random.normal(kx, (1, C, 32, 32), dtype=jnp.float32)
    check(x4, allow_fused=False, block_budget_bytes=4096)

    print("KERNEL_OK")
</pallas_src>

<mosaic_0001>
module attributes {stable_mosaic.version = 11 : i64} {
  func.func @_fused_kernel(%arg0: i32, %arg1: memref<2x4x256xf32, #tpu.memory_space<vmem>>, %arg2: memref<4x4xf32, #tpu.memory_space<vmem>>, %arg3: memref<4x1xf32, #tpu.memory_space<vmem>>, %arg4: memref<4x1xf32, #tpu.memory_space<vmem>>, %arg5: memref<4x1xf32, #tpu.memory_space<vmem>>, %arg6: memref<4x1xf32, #tpu.memory_space<vmem>>, %arg7: memref<2x4x256xf32, #tpu.memory_space<vmem>>) attributes {dimension_semantics = [#tpu.dimension_semantics<arbitrary>], iteration_bounds = array<i64: 1>, scalar_prefetch = 0 : i64, scratch_operands = 0 : i64, tpu.core_type = #tpu.core_type<tc>, window_params = [{pipeline_mode = #tpu.pipeline_mode<synchronous>, transform_indices = @transform_0, window_bounds = array<i64: 2, 4, 256>}, {pipeline_mode = #tpu.pipeline_mode<synchronous>, transform_indices = @transform_1, window_bounds = array<i64: 4, 4>}, {pipeline_mode = #tpu.pipeline_mode<synchronous>, transform_indices = @transform_2, window_bounds = array<i64: 4, 1>}, {pipeline_mode = #tpu.pipeline_mode<synchronous>, transform_indices = @transform_3, window_bounds = array<i64: 4, 1>}, {pipeline_mode = #tpu.pipeline_mode<synchronous>, transform_indices = @transform_4, window_bounds = array<i64: 4, 1>}, {pipeline_mode = #tpu.pipeline_mode<synchronous>, transform_indices = @transform_5, window_bounds = array<i64: 4, 1>}, {pipeline_mode = #tpu.pipeline_mode<synchronous>, transform_indices = @transform_6, window_bounds = array<i64: 2, 4, 256>}]} {
    %c0 = arith.constant 0 : index
    %c0_0 = arith.constant 0 : index
    %c0_1 = arith.constant 0 : index
    %0 = vector.load %arg1[%c0, %c0_0, %c0_1] : memref<2x4x256xf32, #tpu.memory_space<vmem>>, vector<2x4x256xf32>
    %cst = arith.constant dense<0.000000e+00> : vector<2x4xf32>
    %1 = vector.multi_reduction <add>, %0, %cst [2] : vector<2x4x256xf32> to vector<2x4xf32>
    %2 = vector.shape_cast %1 : vector<2x4xf32> to vector<2x4x1xf32>
    %cst_2 = arith.constant dense<0.000000e+00> : vector<4x1xf32>
    %3 = vector.multi_reduction <add>, %2, %cst_2 [0] : vector<2x4x1xf32> to vector<4x1xf32>
    %4 = arith.mulf %0, %0 : vector<2x4x256xf32>
    %cst_3 = arith.constant dense<0.000000e+00> : vector<2x4xf32>
    %5 = vector.multi_reduction <add>, %4, %cst_3 [2] : vector<2x4x256xf32> to vector<2x4xf32>
    %6 = vector.shape_cast %5 : vector<2x4xf32> to vector<2x4x1xf32>
    %cst_4 = arith.constant dense<0.000000e+00> : vector<4x1xf32>
    %7 = vector.multi_reduction <add>, %6, %cst_4 [0] : vector<2x4x1xf32> to vector<4x1xf32>
    %cst_5 = arith.constant 0.001953125 : f32
    %8 = vector.broadcast %cst_5 : f32 to vector<4x1xf32>
    %9 = arith.mulf %3, %8 : vector<4x1xf32>
    %cst_6 = arith.constant 0.001953125 : f32
    %10 = vector.broadcast %cst_6 : f32 to vector<4x1xf32>
    %11 = arith.mulf %7, %10 : vector<4x1xf32>
    %c0_7 = arith.constant 0 : index
    %c0_8 = arith.constant 0 : index
    %12 = vector.load %arg3[%c0_7, %c0_8] : memref<4x1xf32, #tpu.memory_space<vmem>>, vector<4x1xf32>
    %13 = arith.mulf %9, %9 : vector<4x1xf32>
    %14 = arith.subf %11, %13 : vector<4x1xf32>
    %cst_9 = arith.constant 9.99999974E-6 : f32
    %15 = vector.broadcast %cst_9 : f32 to vector<4x1xf32>
    %16 = arith.addf %14, %15 : vector<4x1xf32>
    %17 = math.rsqrt %16 : vector<4x1xf32>
    %18 = arith.mulf %12, %17 : vector<4x1xf32>
    %c0_10 = arith.constant 0 : index
    %c0_11 = arith.constant 0 : index
    %19 = vector.load %arg4[%c0_10, %c0_11] : memref<4x1xf32, #tpu.memory_space<vmem>>, vector<4x1xf32>
    %20 = arith.mulf %18, %9 : vector<4x1xf32>
    %21 = arith.subf %19, %20 : vector<4x1xf32>
    %22 = vector.shape_cast %18 : vector<4x1xf32> to vector<1x4x1xf32>
    %23 = vector.broadcast %22 : vector<1x4x1xf32> to vector<2x4x256xf32>
    %24 = arith.mulf %23, %0 : vector<2x4x256xf32>
    %25 = vector.shape_cast %21 : vector<4x1xf32> to vector<1x4x1xf32>
    %26 = vector.broadcast %25 : vector<1x4x1xf32> to vector<2x4x256xf32>
    %27 = arith.addf %24, %26 : vector<2x4x256xf32>
    %c0_12 = arith.constant 0 : index
    %c0_13 = arith.constant 0 : index
    %28 = vector.load %arg2[%c0_12, %c0_13] : memref<4x4xf32, #tpu.memory_space<vmem>>, vector<4x4xf32>
    %29 = vector.shape_cast %28 : vector<4x4xf32> to vector<1x4x4xf32>
    %30 = vector.broadcast %29 : vector<1x4x4xf32> to vector<2x4x4xf32>
    %cst_14 = arith.constant dense<0.000000e+00> : vector<2x4x256xf32>
    %31 = tpu.matmul %30, %27, %cst_14 {dimension_numbers = #tpu.dot_dimension_numbers<[2], [1], [1], [2], [0, 0, 0, 1, 1, 2], [0], [0]>, precision = #tpu.contract_precision<fp32>} : vector<2x4x4xf32>, vector<2x4x256xf32>, vector<2x4x256xf32> -> vector<2x4x256xf32>
    %32 = arith.addf %0, %31 : vector<2x4x256xf32>
    %cst_15 = arith.constant dense<0.000000e+00> : vector<2x4xf32>
    %33 = vector.multi_reduction <add>, %32, %cst_15 [2] : vector<2x4x256xf32> to vector<2x4xf32>
    %34 = vector.shape_cast %33 : vector<2x4xf32> to vector<2x4x1xf32>
    %cst_16 = arith.constant dense<0.000000e+00> : vector<4x1xf32>
    %35 = vector.multi_reduction <add>, %34, %cst_16 [0] : vector<2x4x1xf32> to vector<4x1xf32>
    %36 = arith.mulf %32, %32 : vector<2x4x256xf32>
    %cst_17 = arith.constant dense<0.000000e+00> : vector<2x4xf32>
    %37 = vector.multi_reduction <add>, %36, %cst_17 [2] : vector<2x4x256xf32> to vector<2x4xf32>
    %38 = vector.shape_cast %37 : vector<2x4xf32> to vector<2x4x1xf32>
    %cst_18 = arith.constant dense<0.000000e+00> : vector<4x1xf32>
    %39 = vector.multi_reduction <add>, %38, %cst_18 [0] : vector<2x4x1xf32> to vector<4x1xf32>
    %cst_19 = arith.constant 0.001953125 : f32
    %40 = vector.broadcast %cst_19 : f32 to vector<4x1xf32>
    %41 = arith.mulf %35, %40 : vector<4x1xf32>
    %cst_20 = arith.constant 0.001953125 : f32
    %42 = vector.broadcast %cst_20 : f32 to vector<4x1xf32>
    %43 = arith.mulf %39, %42 : vector<4x1xf32>
    %c0_21 = arith.constant 0 : index
    %c0_22 = arith.constant 0 : index
    %44 = vector.load %arg5[%c0_21, %c0_22] : memref<4x1xf32, #tpu.memory_space<vmem>>, vector<4x1xf32>
    %45 = arith.mulf %41, %41 : vector<4x1xf32>
    %46 = arith.subf %43, %45 : vector<4x1xf32>
    %cst_23 = arith.constant 9.99999974E-6 : f32
    %47 = vector.broadcast %cst_23 : f32 to vector<4x1xf32>
    %48 = arith.addf %46, %47 : vector<4x1xf32>
    %49 = math.rsqrt %48 : vector<4x1xf32>
    %50 = arith.mulf %44, %49 : vector<4x1xf32>
    %c0_24 = arith.constant 0 : index
    %c0_25 = arith.constant 0 : index
    %51 = vector.load %arg6[%c0_24, %c0_25] : memref<4x1xf32, #tpu.memory_space<vmem>>, vector<4x1xf32>
    %52 = arith.mulf %50, %41 : vector<4x1xf32>
    %53 = arith.subf %51, %52 : vector<4x1xf32>
    %54 = vector.shape_cast %50 : vector<4x1xf32> to vector<1x4x1xf32>
    %55 = vector.broadcast %54 : vector<1x4x1xf32> to vector<2x4x256xf32>
    %56 = arith.mulf %55, %32 : vector<2x4x256xf32>
    %57 = vector.shape_cast %53 : vector<4x1xf32> to vector<1x4x1xf32>
    %58 = vector.broadcast %57 : vector<1x4x1xf32> to vector<2x4x256xf32>
    %59 = arith.addf %56, %58 : vector<2x4x256xf32>
    %c0_26 = arith.constant 0 : index
    %c0_27 = arith.constant 0 : index
    %c0_28 = arith.constant 0 : index
    %60 = vector.load %arg7[%c0_26, %c0_27, %c0_28] : memref<2x4x256xf32, #tpu.memory_space<vmem>>, vector<2x4x256xf32>
    tpu.vector_store %arg7[%c0_26, %c0_27, %c0_28], %59 {strides = array<i32>} : memref<2x4x256xf32, #tpu.memory_space<vmem>>, vector<2x4x256xf32>,
    return
  }
  func.func @transform_0(%arg0: i32) -> (i32, i32, i32) {
    %c0_i32 = arith.constant 0 : i32
    %c0_i32_0 = arith.constant 0 : i32
    %c0_i32_1 = arith.constant 0 : i32
    %c0_i32_2 = arith.constant 0 : i32
    return %c0_i32, %c0_i32_0, %c0_i32_1 : i32, i32, i32
  }
  func.func @transform_1(%arg0: i32) -> (i32, i32) {
    %c0_i32 = arith.constant 0 : i32
    %c0_i32_0 = arith.constant 0 : i32
    %c0_i32_1 = arith.constant 0 : i32
    return %c0_i32, %c0_i32_0 : i32, i32
  }
  func.func @transform_2(%arg0: i32) -> (i32, i32) {
    %c0_i32 = arith.constant 0 : i32
    %c0_i32_0 = arith.constant 0 : i32
    %c0_i32_1 = arith.constant 0 : i32
    return %c0_i32, %c0_i32_0 : i32, i32
  }
  func.func @transform_3(%arg0: i32) -> (i32, i32) {
    %c0_i32 = arith.constant 0 : i32
    %c0_i32_0 = arith.constant 0 : i32
    %c0_i32_1 = arith.constant 0 : i32
    return %c0_i32, %c0_i32_0 : i32, i32
  }
  func.func @transform_4(%arg0: i32) -> (i32, i32) {
    %c0_i32 = arith.constant 0 : i32
    %c0_i32_0 = arith.constant 0 : i32
    %c0_i32_1 = arith.constant 0 : i32
    return %c0_i32, %c0_i32_0 : i32, i32
  }
  func.func @transform_5(%arg0: i32) -> (i32, i32) {
    %c0_i32 = arith.constant 0 : i32
    %c0_i32_0 = arith.constant 0 : i32
    %c0_i32_1 = arith.constant 0 : i32
    return %c0_i32, %c0_i32_0 : i32, i32
  }
  func.func @transform_6(%arg0: i32) -> (i32, i32, i32) {
    %c0_i32 = arith.constant 0 : i32
    %c0_i32_0 = arith.constant 0 : i32
    %c0_i32_1 = arith.constant 0 : i32
    %c0_i32_2 = arith.constant 0 : i32
    return %c0_i32, %c0_i32_0, %c0_i32_1 : i32, i32, i32
  }
}

</mosaic_0001>

<bundles_post_ra>
// kernel: _adapter_forward.1
= control target key start
LH: loop header
LB: loop body
LE: loop exit
PB: predicated region body
PF: predicated region fallthrough
CT: control target
= control target key end

     0   :  { %vm31_vm0 = vcmask 1043456   ;;  %v1145_v20 = vmov 0   ;;  %v1146_v42 = vmov 0.0   ;;  %vm96_vm1 = vcmask 31744   ;;  %s1303_s0 = inlined_call_operand.vmem [shape: f32[2,4,256], index: 0, kind: input, shape index: {}]   ;;  %s1304_s2 = inlined_call_operand.vmem [shape: f32[4,1], index: 2, kind: input, shape index: {}]   ;;  %s1305_s3 = inlined_call_operand.vmem [shape: f32[4,1], index: 3, kind: input, shape index: {}]   ;;  %s1306_s1 = inlined_call_operand.vmem [shape: f32[4,4], index: 1, kind: input, shape index: {}]   ;;  %s1307_s4 = inlined_call_operand.vmem [shape: f32[4,1], index: 4, kind: input, shape index: {}]   ;;  %s1308_s5 = inlined_call_operand.vmem [shape: f32[4,1], index: 5, kind: input, shape index: {}]   ;;  %s1309_s6 = inlined_call_operand.vmem [shape: f32[2,4,256], index: 6, kind: output, shape index: {}]  }
   0x1   :  { %v1185_v0 = vld [vmem:[%s1303_s0] sm:$0xff]  ;;  %v1190_v1 = vld [vmem:[%s1303_s0 + $0x8] sm:$0xff]  ;;  %1137 = vset.pattern.permute.xlu0 %v1145_v20  ;;  %1138 = vset.pattern.permute.xlu1 %v1145_v20 }
   0x2   :  { %v1194_v2 = vcombine.high %v1185_v0, %v1185_v0  ;;  %v32_v3 = vsel %vm31_vm0, %v1185_v0, 0.0  ;;  %v45_v4 = vmul.f32 %v1185_v0, %v1185_v0  ;;  %v1202_v5 = vcombine.high %v1190_v1, %v1190_v1  ;;  %v68_v36 = vld [vmem:[%s1304_s2] sm:$0xf]  ;;  %172 = vmatprep.mubr.f32.mxu0 %v1146_v42  ;;  %258 = vmatprep.mubr.f32.mxu1 %v1146_v42 }
   0x3   :  { %v37_v6 = vsel %vm31_vm0, %v1190_v1, 0.0  ;;  %v46_v7 = vmul.f32 %v1190_v1, %v1190_v1  ;;  %v74_v39 = vld [vmem:[%s1305_s3] sm:$0xf] }
   0x4   :  { %v33_v8 = vsel %vm31_vm0, %v1194_v2, 0.0  ;;  %v49_v9 = vcombine.high %v45_v4, %v45_v4  ;;  %v53_v10 = vsel %vm31_vm0, %v45_v4, 0.0  ;;  %v38_v11 = vsel %vm31_vm0, %v1202_v5, 0.0  ;;  %v95_v43 = vld [vmem:[%s1306_s1] sm:$0xf] }
   0x5   :  { %v34_v12 = vadd.f32 %v33_v8, %v32_v3  ;;  %v50_v13 = vcombine.high %v46_v7, %v46_v7  ;;  %v58_v15 = vsel %vm31_vm0, %v46_v7, 0.0  ;;  %v39_v17 = vadd.f32 %v38_v11, %v37_v6 }
   0x6   :  { %v54_v14 = vsel %vm31_vm0, %v49_v9, 0.0  ;;  %v98_v44 = vsel %vm96_vm1, %v95_v43, 0 }
   0x7   :  { %35 = vadd.xlane.f32.xlu0 %v34_v12  ;;  %v55_v16 = vadd.f32 %v54_v14, %v53_v10  ;;  %v59_v18 = vsel %vm31_vm0, %v50_v13, 0.0  ;;  %v1231_v45 = vand.u32 4294901760, %v98_v44 }
   0x8   :  { %v60_v19 = vadd.f32 %v59_v18, %v58_v15 }
   0x9   :  { %56 = vadd.xlane.f32.xlu1 %v55_v16  ;;  %v1234_v46 = vsub.f32 %v98_v44, %v1231_v45 }
   0xb   :  { %40 = vadd.xlane.f32.xlu0 %v39_v17  ;;  %v1237_v47 = vand.u32 4294901760, %v1234_v46 }
   0xd   :  { %61 = vadd.xlane.f32.xlu1 %v60_v19  ;;  %v176_v49 = vsub.f32 %v1234_v46, %v1237_v47 }
   0xf   :  { %v177_v62 = vand.u32 4294901760, %v176_v49 }
  0x90   :  { %v36_v21 = vpop.xlane.xlu0 %35 }
  0x91   :  { %v42_v24 = vsel %vm31_vm0, %v36_v21, 0.0 }
  0x92   :  { %v57_v22 = vpop.xlane.xlu1 %56 }
  0x93   :  { %v63_v28 = vsel %vm31_vm0, %v57_v22, 0.0 }
  0x94   :  { %v41_v23 = vpop.xlane.xlu0 %40 }
  0x95   :  { %v43_v25 = vsel %vm31_vm0, %v41_v23, 0.0 }
  0x96   :  { %v44_v26 = vadd.f32 %v43_v25, %v42_v24  ;;  %v62_v27 = vpop.xlane.xlu1 %61 }
  0x97   :  { %v64_v29 = vsel %vm31_vm0, %v62_v27, 0.0 }
  0x98   :  { %v66_v30 = vmul.f32 0.001953125, %v44_v26  ;;  %v65_v31 = vadd.f32 %v64_v29, %v63_v28 }
  0x9a   :  { %v69_v32 = vmul.f32 %v66_v30, %v66_v30  ;;  %v67_v33 = vmul.f32 0.001953125, %v65_v31 }
  0x9c   :  { %v70_v34 = vsub.f32 %v67_v33, %v69_v32 }
  0x9e   :  { %v71_v35 = vadd.f32 1e-05, %v70_v34 }
  0xa0   :  { %1141 = vrsqrt.f32 %v71_v35 }
  0xad   :  { %v1142_v37 = vpop.eup %1141 }
  0xae   :  { %v73_v38 = vmul.f32 %v1142_v37, %v68_v36 }
  0xb0   :  { %79 = vperm.xlu0 %1137, %v73_v38   ;;  %v75_v40 = vmul.f32 %v73_v38, %v66_v30 }
  0xb2   :  { %v76_v41 = vsub.f32 %v74_v39, %v75_v40 }
  0xb4   :  { %88 = vperm.xlu1 %1138, %v76_v41  }
 0x12b   :  { %v80_v48 = vpop.permute.xlu0 %79 }
 0x12c   :  { %v82_v50 = vmul.f32 %v80_v48, %v1185_v0  ;;  %v83_v51 = vmul.f32 %v80_v48, %v1194_v2  ;;  %v84_v52 = vmul.f32 %v80_v48, %v1190_v1  ;;  %v85_v53 = vmul.f32 %v80_v48, %v1202_v5 }
 0x12f   :  { %v89_v54 = vpop.permute.xlu1 %88 }
 0x130   :  { %v91_v55 = vadd.f32 %v89_v54, %v82_v50  ;;  %v92_v56 = vadd.f32 %v89_v54, %v83_v51  ;;  %v93_v57 = vadd.f32 %v89_v54, %v84_v52  ;;  %v94_v58 = vadd.f32 %v89_v54, %v85_v53 }
 0x132   :  { %v101_v59 = vsel %vm31_vm0, %v91_v55, 0  ;;  %v104_v60 = vsel %vm31_vm0, %v92_v56, 0  ;;  %v575_v61 = vsel %vm31_vm0, %v94_v58, 0  ;;  %v572_v63 = vsel %vm31_vm0, %v93_v57, 0 }
 0x133   :  { %v136_v3 = vand.u32 4294901760, %v104_v60  ;;  %v138_v2 = vand.u32 4294901760, %v101_v59  ;;  %v607_v4 = vand.u32 4294901760, %v575_v61  ;;  %v609_v7 = vand.u32 4294901760, %v572_v63 }
 0x135   :  { %137 = vmatprep.subr.mxu0 %v136_v3  ;;  %v215_v6 = vsub.f32 %v104_v60, %v136_v3  ;;  %v221_v5 = vsub.f32 %v101_v59, %v138_v2  ;;  %v686_v10 = vsub.f32 %v575_v61, %v607_v4  ;;  %v692_v13 = vsub.f32 %v572_v63, %v609_v7 }
 0x136   :  { %139 = vmatpush1.msra.mxu0 %v138_v2 }
 0x137   :  { %178 = vmatmul.mubr.f32.vlgmr.msra.gmra.mxu0 %v177_v62  ;;  %298 = vmatprep.subr.mxu0 %v215_v6  ;;  %v216_v8 = vand.u32 4294901760, %v215_v6  ;;  %v222_v9 = vand.u32 4294901760, %v221_v5  ;;  %v687_v16 = vand.u32 4294901760, %v686_v10  ;;  %v693_v17 = vand.u32 4294901760, %v692_v13 }
 0x138   :  { %301 = vmatpush1.msra.mxu0 %v221_v5  ;;  %334 = vmatprep.mubr.f32.mxu0 %v1146_v42 }
 0x139   :  { %452 = vmatprep.subr.mxu0 %v216_v8  ;;  %v217_v11 = vsub.f32 %v215_v6, %v216_v8  ;;  %v223_v12 = vsub.f32 %v221_v5, %v222_v9  ;;  %v688_v18 = vsub.f32 %v686_v10, %v687_v16  ;;  %v694_v19 = vsub.f32 %v692_v13, %v693_v17 }
 0x13b   :  { %337 = vmatmul.mubr.f32.vlgmr.msra.gmra.mxu0 %v1234_v46  ;;  %v218_v14 = vand.u32 4294901760, %v217_v11  ;;  %v224_v15 = vand.u32 4294901760, %v223_v12  ;;  %v689_v20 = vand.u32 4294901760, %v688_v18  ;;  %v695_v21 = vand.u32 4294901760, %v694_v19 }
 0x13c   :  { %456 = vmatpush1.msra.mxu0 %v222_v9  ;;  %489 = vmatprep.mubr.f32.mxu0 %v1146_v42 }
 0x13d   :  { %608 = vmatprep.subr.mxu0 %v607_v4  ;;  %219 = vmatprep.subr.mxu1 %v218_v14 }
 0x13e   :  { %225 = vmatpush1.msra.mxu1 %v224_v15 }
 0x13f   :  { %260 = vmatmul.mubr.f32.vlgmr.msra.gmra.mxu1 %v1231_v45  ;;  %374 = vmatprep.subr.mxu1 %v136_v3 }
 0x140   :  { %491 = vmatmul.mubr.f32.vlgmr.msra.gmra.mxu0 %v1231_v45  ;;  %376 = vmatpush1.msra.mxu1 %v138_v2 }
 0x141   :  { %610 = vmatpush1.msra.mxu0 %v609_v7  ;;  %528 = vmatprep.subr.mxu1 %v136_v3 }
 0x142   :  { %769 = vmatprep.subr.mxu0 %v686_v10  ;;  %409 = vmatprep.mubr.f32.mxu1 %v1146_v42 }
 0x143   :  { %643 = vmatprep.mubr.f32.mxu0 %v1146_v42  ;;  %413 = vmatmul.mubr.f32.vlgmr.msra.gmra.mxu1 %v1237_v47 }
 0x144   :  { %530 = vmatpush1.msra.mxu1 %v138_v2  ;;  %649 = vmatmul.mubr.f32.vlgmr.msra.gmra.mxu0 %v177_v62 }
 0x145   :  { %772 = vmatpush1.msra.mxu0 %v692_v13  ;;  %690 = vmatprep.subr.mxu1 %v689_v20 }
 0x146   :  { %923 = vmatprep.subr.mxu0 %v687_v16  ;;  %563 = vmatprep.mubr.f32.mxu1 %v1146_v42 }
 0x147   :  { %805 = vmatprep.mubr.f32.mxu0 %v1146_v42  ;;  %565 = vmatmul.mubr.f32.vlgmr.msra.gmra.mxu1 %v1231_v45 }
 0x148   :  { %696 = vmatpush1.msra.mxu1 %v695_v21  ;;  %808 = vmatmul.mubr.f32.vlgmr.msra.gmra.mxu0 %v1234_v46 }
 0x149   :  { %927 = vmatpush1.msra.mxu0 %v693_v17  ;;  %845 = vmatprep.subr.mxu1 %v607_v4 }
 0x14a   :  { %729 = vmatprep.mubr.f32.mxu1 %v1146_v42  ;;  %960 = vmatprep.mubr.f32.mxu0 %v1146_v42 }
 0x14b   :  { %731 = vmatmul.mubr.f32.vlgmr.msra.gmra.mxu1 %v1231_v45 }
 0x14c   :  { %847 = vmatpush1.msra.mxu1 %v609_v7  ;;  %880 = vmatprep.mubr.f32.mxu1 %v1146_v42 }
 0x14d   :  { %999 = vmatprep.subr.mxu1 %v607_v4  ;;  %962 = vmatmul.mubr.f32.vlgmr.msra.gmra.mxu0 %v1231_v45 }
 0x14f   :  { %884 = vmatmul.mubr.f32.vlgmr.msra.gmra.mxu1 %v1237_v47 }
 0x150   :  { %1001 = vmatpush1.msra.mxu1 %v609_v7  ;;  %1034 = vmatprep.mubr.f32.mxu1 %v1146_v42 }
 0x153   :  { %1036 = vmatmul.mubr.f32.vlgmr.msra.gmra.mxu1 %v1231_v45 }
 0x1f7   :  { %v179_v22 = vpop.f32.mrf.mxu0 }
 0x1f9   :  { %v181_v23 = vpop.f32.mrf.mxu0 }
 0x1fb   :  { %v338_v24 = vpop.f32.mrf.mxu0 }
 0x1fd   :  { %v340_v25 = vpop.f32.mrf.mxu0 }
 0x1ff   :  { %v261_v26 = vpop.f32.mrf.mxu1 }
 0x200   :  { %v262_v27 = vadd.f32 %v261_v26, %v179_v22  ;;  %v492_v28 = vpop.f32.mrf.mxu0 }
 0x201   :  { %v263_v29 = vpop.f32.mrf.mxu1 }
 0x202   :  { %v339_v30 = vadd.f32 %v338_v24, %v262_v27  ;;  %v264_v31 = vadd.f32 %v263_v29, %v181_v23  ;;  %v494_v32 = vpop.f32.mrf.mxu0 }
 0x203   :  { %v414_v33 = vpop.f32.mrf.mxu1 }
 0x204   :  { %v341_v34 = vadd.f32 %v340_v25, %v264_v31  ;;  %v415_v35 = vadd.f32 %v414_v33, %v339_v30  ;;  %v650_v36 = vpop.f32.mrf.mxu0 }
 0x205   :  { %v416_v37 = vpop.f32.mrf.mxu1 }
 0x206   :  { %v493_v38 = vadd.f32 %v492_v28, %v415_v35  ;;  %v417_v39 = vadd.f32 %v416_v37, %v341_v34  ;;  %v652_v40 = vpop.f32.mrf.mxu0 }
 0x207   :  { %v566_v41 = vpop.f32.mrf.mxu1 }
 0x208   :  { %v495_v42 = vadd.f32 %v494_v32, %v417_v39  ;;  %v809_v43 = vpop.f32.mrf.mxu0  ;;  %v567_v45 = vadd.f32 %v566_v41, %v493_v38  ;;  %v1094_v39 = vld [vmem:[%s1307_s4] sm:$0xf] }
 0x209   :  { %v568_v44 = vpop.f32.mrf.mxu1 }
 0x20a   :  { %v569_v46 = vadd.f32 %v568_v44, %v495_v42  ;;  %v811_v48 = vpop.f32.mrf.mxu0  ;;  %v1100_v42 = vld [vmem:[%s1308_s5] sm:$0xf] }
 0x20b   :  { %v732_v47 = vpop.f32.mrf.mxu1 }
 0x20c   :  { %v1046_v49 = vcombine.low %v567_v45, %v569_v46  ;;  %v733_v50 = vadd.f32 %v732_v47, %v650_v36 }
 0x20d   :  { %v734_v51 = vpop.f32.mrf.mxu1  ;;  %v963_v56 = vpop.f32.mrf.mxu0 }
 0x20e   :  { %v1270_v52 = vadd.f32 %v1046_v49, %v1185_v0  ;;  %v810_v53 = vadd.f32 %v809_v43, %v733_v50  ;;  %v735_v54 = vadd.f32 %v734_v51, %v652_v40 }
 0x20f   :  { %v885_v55 = vpop.f32.mrf.mxu1  ;;  %v965_v2 = vpop.f32.mrf.mxu0 }
 0x210   :  { %v812_v57 = vadd.f32 %v811_v48, %v735_v54  ;;  %v886_v58 = vadd.f32 %v885_v55, %v810_v53  ;;  %v1054_v59 = vcombine.high %v1270_v52, %v1270_v52  ;;  %v1071_v61 = vmul.f32 %v1270_v52, %v1270_v52 }
 0x211   :  { %v887_v60 = vpop.f32.mrf.mxu1  ;;  %v1058_v3 = vsel %vm31_vm0, %v1270_v52, 0.0 }
 0x212   :  { %v964_v62 = vadd.f32 %v963_v56, %v886_v58  ;;  %v888_v63 = vadd.f32 %v887_v60, %v812_v57  ;;  %v1059_v0 = vsel %vm31_vm0, %v1054_v59, 0.0  ;;  %v1075_v5 = vcombine.high %v1071_v61, %v1071_v61 }
 0x213   :  { %v1037_v4 = vpop.f32.mrf.mxu1  ;;  %v1060_v6 = vadd.f32 %v1059_v0, %v1058_v3  ;;  %v1079_v12 = vsel %vm31_vm0, %v1071_v61, 0.0 }
 0x214   :  { %v966_v7 = vadd.f32 %v965_v2, %v888_v63  ;;  %v1080_v9 = vsel %vm31_vm0, %v1075_v5, 0.0  ;;  %v1038_v10 = vadd.f32 %v1037_v4, %v964_v62 }
 0x215   :  { %v1039_v8 = vpop.f32.mrf.mxu1  ;;  %1061 = vadd.xlane.f32.xlu1 %v1060_v6  ;;  %v1081_v13 = vadd.f32 %v1080_v9, %v1079_v12 }
 0x216   :  { %v1040_v11 = vadd.f32 %v1039_v8, %v966_v7 }
 0x218   :  { %v1047_v14 = vcombine.low %v1038_v10, %v1040_v11 }
 0x219   :  { %1082 = vadd.xlane.f32.xlu1 %v1081_v13 }
 0x21a   :  { %v1051_v15 = vadd.f32 %v1047_v14, %v1190_v1 }
 0x21c   :  { %v1055_v16 = vcombine.high %v1051_v15, %v1051_v15  ;;  %v1072_v17 = vmul.f32 %v1051_v15, %v1051_v15  ;;  %v1063_v18 = vsel %vm31_vm0, %v1051_v15, 0.0 }
 0x21e   :  { %v1064_v19 = vsel %vm31_vm0, %v1055_v16, 0.0  ;;  %v1076_v20 = vcombine.high %v1072_v17, %v1072_v17  ;;  %v1084_v22 = vsel %vm31_vm0, %v1072_v17, 0.0 }
 0x21f   :  { %v1065_v21 = vadd.f32 %v1064_v19, %v1063_v18 }
 0x220   :  { %v1085_v23 = vsel %vm31_vm0, %v1076_v20, 0.0 }
 0x221   :  { %1066 = vadd.xlane.f32.xlu0 %v1065_v21  ;;  %v1086_v24 = vadd.f32 %v1085_v23, %v1084_v22 }
 0x223   :  { %1087 = vadd.xlane.f32.xlu1 %v1086_v24 }
 0x29e   :  { %v1062_v25 = vpop.xlane.xlu1 %1061 }
 0x29f   :  { %v1068_v1 = vsel %vm31_vm0, %v1062_v25, 0.0 }
 0x2a2   :  { %v1083_v26 = vpop.xlane.xlu1 %1082 }
 0x2a3   :  { %v1089_v31 = vsel %vm31_vm0, %v1083_v26, 0.0 }
 0x2aa   :  { %v1067_v27 = vpop.xlane.xlu0 %1066 }
 0x2ab   :  { %v1069_v28 = vsel %vm31_vm0, %v1067_v27, 0.0 }
 0x2ac   :  { %v1070_v29 = vadd.f32 %v1069_v28, %v1068_v1  ;;  %v1088_v30 = vpop.xlane.xlu1 %1087 }
 0x2ad   :  { %v1090_v32 = vsel %vm31_vm0, %v1088_v30, 0.0 }
 0x2ae   :  { %v1092_v33 = vmul.f32 0.001953125, %v1070_v29  ;;  %v1091_v34 = vadd.f32 %v1090_v32, %v1089_v31 }
 0x2b0   :  { %v1095_v35 = vmul.f32 %v1092_v33, %v1092_v33  ;;  %v1093_v36 = vmul.f32 0.001953125, %v1091_v34 }
 0x2b2   :  { %v1096_v37 = vsub.f32 %v1093_v36, %v1095_v35 }
 0x2b4   :  { %v1097_v38 = vadd.f32 1e-05, %v1096_v37 }
 0x2b6   :  { %1143 = vrsqrt.f32 %v1097_v38 }
 0x2c3   :  { %v1144_v40 = vpop.eup %1143 }
 0x2c4   :  { %v1099_v41 = vmul.f32 %v1144_v40, %v1094_v39 }
 0x2c6   :  { %1105 = vperm.xlu1 %1138, %v1099_v41   ;;  %v1101_v43 = vmul.f32 %v1099_v41, %v1092_v33 }
 0x2c8   :  { %v1102_v44 = vsub.f32 %v1100_v42, %v1101_v43 }
 0x2ca   :  { %1114 = vperm.xlu0 %1137, %v1102_v44  }
 0x341   :  { %v1106_v45 = vpop.permute.xlu1 %1105 }
 0x342   :  { %v1108_v46 = vmul.f32 %v1106_v45, %v1270_v52  ;;  %v1109_v47 = vmul.f32 %v1106_v45, %v1054_v59  ;;  %v1110_v48 = vmul.f32 %v1106_v45, %v1051_v15  ;;  %v1111_v49 = vmul.f32 %v1106_v45, %v1055_v16 }
 0x345   :  { %v1115_v50 = vpop.permute.xlu0 %1114 }
 0x346   :  { %v1117_v51 = vadd.f32 %v1115_v50, %v1108_v46  ;;  %v1118_v53 = vadd.f32 %v1115_v50, %v1109_v47  ;;  %v1119_v54 = vadd.f32 %v1115_v50, %v1110_v48  ;;  %v1120_v55 = vadd.f32 %v1115_v50, %v1111_v49 }
 0x348   :  { %v1125_v56 = vcombine.low %v1117_v51, %v1118_v53  ;;  %v1126_v57 = vcombine.low %v1119_v54, %v1120_v55 }
 0x34a   :  { %1129 = vst [vmem:[%s1309_s6] sm:$0xff] %v1125_v56  ;;  %1130 = vst [vmem:[%s1309_s6 + $0x8] sm:$0xff] %v1126_v57 }

</bundles_post_ra>
